<compile_context>
chip_gen: v7x
topology: tpu7x:2x2x1
jax: 0.10.0
libtpu: 0.0.40
codegen_flags: <defaults>
</compile_context>

<pallas_src>
import jax
import jax.numpy as jnp
from jax.experimental import pallas as pl
from jax.experimental.pallas import tpu as pltpu

EPS = 1e-12  # MolTrans LayerNorm variance_epsilon (BERT-style)


def _round_up(x, m):
    return ((x + m - 1) // m) * m


def embeddings_kernel(ids_ref, pos_ref, w_ref, p_ref, gamma_ref, beta_ref, out_ref):
    # ids_ref / pos_ref: (TILE, 1) int32 token ids & position ids for this tile
    # w_ref:             (V, H) word-embedding table, VMEM resident
    # p_ref:             (P, H) position-embedding table, VMEM resident
    # gamma_ref/beta_ref:(1, H) LayerNorm params, VMEM resident
    # out_ref:           (TILE, H) output tile (lane/sublane dense)
    tile = out_ref.shape[0]
    V = w_ref.shape[0]
    P = p_ref.shape[0]
    H = out_ref.shape[1]

    ids = ids_ref[...]   # (TILE, 1) int32
    pos = pos_ref[...]   # (TILE, 1) int32

    # On-chip gather via exact one-hot matmul on the MXU: each row of the
    # one-hot has a single 1.0, so the dot reproduces the table row exactly.
    w_oh = (ids == jax.lax.broadcasted_iota(jnp.int32, (tile, V), 1)).astype(jnp.float32)
    p_oh = (pos == jax.lax.broadcasted_iota(jnp.int32, (tile, P), 1)).astype(jnp.float32)
    we = jnp.dot(w_oh, w_ref[...].astype(jnp.float32), preferred_element_type=jnp.float32)
    pe = jnp.dot(p_oh, p_ref[...].astype(jnp.float32), preferred_element_type=jnp.float32)

    x = we + pe  # (TILE, H) float32

    # LayerNorm: two lane reductions (XLU) + one rsqrt (EUP) + VPU elementwise.
    inv_h = jnp.float32(1.0 / H)
    u = jnp.sum(x, axis=-1, keepdims=True) * inv_h
    d = x - u
    var = jnp.sum(d * d, axis=-1, keepdims=True) * inv_h
    xhat = d * jax.lax.rsqrt(var + EPS)
    y = gamma_ref[...].astype(jnp.float32) * xhat + beta_ref[...].astype(jnp.float32)

    out_ref[...] = y.astype(out_ref.dtype)
    # TODO(synk): dropout is identity in eval mode; training-mode masking would
    # use pltpu.prng_seed + pltpu.stateful_bernoulli.


def embeddings_forward(input_ids, word_table, pos_table, gamma, beta, *, tile=256):
    B, S = input_ids.shape
    V, H = word_table.shape
    P, _ = pos_table.shape
    N = B * S

    # Flatten tokens and precompute flat position ids (token t -> t % S).
    ids = input_ids.reshape(N).astype(jnp.int32)
    pos_ids = jnp.tile(jnp.arange(S, dtype=jnp.int32), B)

    # Sublane-aligned tile; pad the token count to a multiple of the tile.
    tile = min(tile, _round_up(N, 8))
    tile = _round_up(tile, 8)
    n_pad = _round_up(N, tile)
    if n_pad != N:
        ids = jnp.pad(ids, (0, n_pad - N))        # id 0 / pos 0 are valid rows
        pos_ids = jnp.pad(pos_ids, (0, n_pad - N))
    ids2 = ids.reshape(n_pad, 1)
    pos2 = pos_ids.reshape(n_pad, 1)

    grid_spec = pltpu.PrefetchScalarGridSpec(
        num_scalar_prefetch=0,
        grid=(n_pad // tile,),
        in_specs=[
            pl.BlockSpec((tile, 1), lambda i: (i, 0)),   # token ids for this tile
            pl.BlockSpec((tile, 1), lambda i: (i, 0)),   # position ids for this tile
            pl.BlockSpec((V, H), lambda i: (0, 0)),      # word table (resident)
            pl.BlockSpec((P, H), lambda i: (0, 0)),      # position table (resident)
            pl.BlockSpec((1, H), lambda i: (0, 0)),      # gamma (resident)
            pl.BlockSpec((1, H), lambda i: (0, 0)),      # beta (resident)
        ],
        out_specs=pl.BlockSpec((tile, H), lambda i: (i, 0)),
    )

    out = pl.pallas_call(
        embeddings_kernel,
        out_shape=jax.ShapeDtypeStruct((n_pad, H), jnp.float32),
        grid_spec=grid_spec,
        compiler_params=pltpu.CompilerParams(
            # independent token tiles -> megacore-splittable on v7x
            dimension_semantics=("parallel",),
        ),
    )(ids2, pos2, word_table, pos_table, gamma.reshape(1, H), beta.reshape(1, H))

    return out[:N].reshape(B, S, H)


def embeddings_reference(input_ids, word_table, pos_table, gamma, beta):
    B, S = input_ids.shape
    we = word_table[input_ids]                     # (B, S, H)
    pe = pos_table[jnp.arange(S)][None, :, :]      # (1, S, H)
    x = we + pe
    u = jnp.mean(x, axis=-1, keepdims=True)
    s = jnp.mean((x - u) ** 2, axis=-1, keepdims=True)
    xhat = (x - u) / jnp.sqrt(s + EPS)
    return gamma * xhat + beta


if __name__ == "__main__":
    # Small shapes consistent with the module's forward
    vocab_size = 50
    hidden_size = 32
    max_position_size = 16
    batch, seq = 2, 8

    key = jax.random.PRNGKey(0)
    k_ids, k_w, k_p = jax.random.split(key, 3)

    input_ids = jax.random.randint(k_ids, (batch, seq), 0, vocab_size, dtype=jnp.int32)
    word_table = jax.random.normal(k_w, (vocab_size, hidden_size), dtype=jnp.float32) * 0.02
    pos_table = jax.random.normal(k_p, (max_position_size, hidden_size), dtype=jnp.float32) * 0.02
    gamma = jnp.ones((hidden_size,), dtype=jnp.float32)   # LayerNorm init: ones
    beta = jnp.zeros((hidden_size,), dtype=jnp.float32)   # LayerNorm init: zeros

    out = embeddings_forward(input_ids, word_table, pos_table, gamma, beta)
    out = jax.block_until_ready(out)

    ref = embeddings_reference(input_ids, word_table, pos_table, gamma, beta)
    assert out.shape == (batch, seq, hidden_size)
    assert jnp.allclose(out, ref, atol=1e-5, rtol=1e-5), "mismatch vs reference"

    print("KERNEL_OK")
</pallas_src>

<mosaic_0001>
module attributes {stable_mosaic.version = 11 : i64} {
  func.func @embeddings_kernel(%arg0: i32, %arg1: memref<16x1xi32, #tpu.memory_space<vmem>>, %arg2: memref<16x1xi32, #tpu.memory_space<vmem>>, %arg3: memref<50x32xf32, #tpu.memory_space<vmem>>, %arg4: memref<16x32xf32, #tpu.memory_space<vmem>>, %arg5: memref<1x32xf32, #tpu.memory_space<vmem>>, %arg6: memref<1x32xf32, #tpu.memory_space<vmem>>, %arg7: memref<16x32xf32, #tpu.memory_space<vmem>>) attributes {dimension_semantics = [#tpu.dimension_semantics<parallel>], iteration_bounds = array<i64: 1>, scalar_prefetch = 0 : i64, scratch_operands = 0 : i64, tpu.core_type = #tpu.core_type<tc>, window_params = [{transform_indices = @transform_0, window_bounds = array<i64: 16, 1>}, {transform_indices = @transform_1, window_bounds = array<i64: 16, 1>}, {pipeline_mode = #tpu.pipeline_mode<synchronous>, transform_indices = @transform_2, window_bounds = array<i64: 50, 32>}, {pipeline_mode = #tpu.pipeline_mode<synchronous>, transform_indices = @transform_3, window_bounds = array<i64: 16, 32>}, {pipeline_mode = #tpu.pipeline_mode<synchronous>, transform_indices = @transform_4, window_bounds = array<i64: 1, 32>}, {pipeline_mode = #tpu.pipeline_mode<synchronous>, transform_indices = @transform_5, window_bounds = array<i64: 1, 32>}, {transform_indices = @transform_6, window_bounds = array<i64: 16, 32>}]} {
    %c0 = arith.constant 0 : index
    %c0_0 = arith.constant 0 : index
    %0 = vector.load %arg1[%c0, %c0_0] : memref<16x1xi32, #tpu.memory_space<vmem>>, vector<16x1xi32>
    %c0_1 = arith.constant 0 : index
    %c0_2 = arith.constant 0 : index
    %1 = vector.load %arg2[%c0_1, %c0_2] : memref<16x1xi32, #tpu.memory_space<vmem>>, vector<16x1xi32>
    %2 = tpu.iota {dimensions = array<i32: 1>} : vector<16x50xi32>
    %3 = vector.broadcast %0 : vector<16x1xi32> to vector<16x50xi32>
    %4 = arith.cmpi eq, %3, %2 : vector<16x50xi32>
    %5 = arith.extui %4 : vector<16x50xi1> to vector<16x50xi32>
    %6 = arith.sitofp %5 : vector<16x50xi32> to vector<16x50xf32>
    %7 = tpu.iota {dimensions = array<i32: 1>} : vector<16x16xi32>
    %8 = vector.broadcast %1 : vector<16x1xi32> to vector<16x16xi32>
    %9 = arith.cmpi eq, %8, %7 : vector<16x16xi32>
    %10 = arith.extui %9 : vector<16x16xi1> to vector<16x16xi32>
    %11 = arith.sitofp %10 : vector<16x16xi32> to vector<16x16xf32>
    %c0_3 = arith.constant 0 : index
    %c0_4 = arith.constant 0 : index
    %12 = vector.load %arg3[%c0_3, %c0_4] : memref<50x32xf32, #tpu.memory_space<vmem>>, vector<50x32xf32>
    %cst = arith.constant dense<0.000000e+00> : vector<16x32xf32>
    %13 = tpu.matmul %6, %12, %cst {dimension_numbers = #tpu.dot_dimension_numbers<[1], [0], [0], [1], [0, 0, 1, 1], [], []>} : vector<16x50xf32>, vector<50x32xf32>, vector<16x32xf32> -> vector<16x32xf32>
    %c0_5 = arith.constant 0 : index
    %c0_6 = arith.constant 0 : index
    %14 = vector.load %arg4[%c0_5, %c0_6] : memref<16x32xf32, #tpu.memory_space<vmem>>, vector<16x32xf32>
    %cst_7 = arith.constant dense<0.000000e+00> : vector<16x32xf32>
    %15 = tpu.matmul %11, %14, %cst_7 {dimension_numbers = #tpu.dot_dimension_numbers<[1], [0], [0], [1], [0, 0, 1, 1], [], []>} : vector<16x16xf32>, vector<16x32xf32>, vector<16x32xf32> -> vector<16x32xf32>
    %16 = arith.addf %13, %15 : vector<16x32xf32>
    %cst_8 = arith.constant dense<0.000000e+00> : vector<16xf32>
    %17 = vector.multi_reduction <add>, %16, %cst_8 [1] : vector<16x32xf32> to vector<16xf32>
    %18 = vector.shape_cast %17 : vector<16xf32> to vector<16x1xf32>
    %cst_9 = arith.constant 3.125000e-02 : f32
    %19 = vector.broadcast %cst_9 : f32 to vector<16x1xf32>
    %20 = arith.mulf %18, %19 : vector<16x1xf32>
    %21 = vector.broadcast %20 : vector<16x1xf32> to vector<16x32xf32>
    %22 = arith.subf %16, %21 : vector<16x32xf32>
    %23 = arith.mulf %22, %22 : vector<16x32xf32>
    %cst_10 = arith.constant dense<0.000000e+00> : vector<16xf32>
    %24 = vector.multi_reduction <add>, %23, %cst_10 [1] : vector<16x32xf32> to vector<16xf32>
    %25 = vector.shape_cast %24 : vector<16xf32> to vector<16x1xf32>
    %cst_11 = arith.constant 3.125000e-02 : f32
    %26 = vector.broadcast %cst_11 : f32 to vector<16x1xf32>
    %27 = arith.mulf %25, %26 : vector<16x1xf32>
    %cst_12 = arith.constant 9.99999996E-13 : f32
    %28 = vector.broadcast %cst_12 : f32 to vector<16x1xf32>
    %29 = arith.addf %27, %28 : vector<16x1xf32>
    %30 = math.rsqrt %29 : vector<16x1xf32>
    %31 = vector.broadcast %30 : vector<16x1xf32> to vector<16x32xf32>
    %32 = arith.mulf %22, %31 : vector<16x32xf32>
    %c0_13 = arith.constant 0 : index
    %c0_14 = arith.constant 0 : index
    %33 = vector.load %arg5[%c0_13, %c0_14] : memref<1x32xf32, #tpu.memory_space<vmem>>, vector<1x32xf32>
    %34 = vector.broadcast %33 : vector<1x32xf32> to vector<16x32xf32>
    %35 = arith.mulf %34, %32 : vector<16x32xf32>
    %c0_15 = arith.constant 0 : index
    %c0_16 = arith.constant 0 : index
    %36 = vector.load %arg6[%c0_15, %c0_16] : memref<1x32xf32, #tpu.memory_space<vmem>>, vector<1x32xf32>
    %37 = vector.broadcast %36 : vector<1x32xf32> to vector<16x32xf32>
    %38 = arith.addf %35, %37 : vector<16x32xf32>
    %c0_17 = arith.constant 0 : index
    %c0_18 = arith.constant 0 : index
    %39 = vector.load %arg7[%c0_17, %c0_18] : memref<16x32xf32, #tpu.memory_space<vmem>>, vector<16x32xf32>
    tpu.vector_store %arg7[%c0_17, %c0_18], %38 {strides = array<i32>} : memref<16x32xf32, #tpu.memory_space<vmem>>, vector<16x32xf32>,
    return
  }
  func.func @transform_0(%arg0: i32) -> (i32, i32) {
    %c0_i32 = arith.constant 0 : i32
    %c0_i32_0 = arith.constant 0 : i32
    return %arg0, %c0_i32 : i32, i32
  }
  func.func @transform_1(%arg0: i32) -> (i32, i32) {
    %c0_i32 = arith.constant 0 : i32
    %c0_i32_0 = arith.constant 0 : i32
    return %arg0, %c0_i32 : i32, i32
  }
  func.func @transform_2(%arg0: i32) -> (i32, i32) {
    %c0_i32 = arith.constant 0 : i32
    %c0_i32_0 = arith.constant 0 : i32
    %c0_i32_1 = arith.constant 0 : i32
    return %c0_i32, %c0_i32_0 : i32, i32
  }
  func.func @transform_3(%arg0: i32) -> (i32, i32) {
    %c0_i32 = arith.constant 0 : i32
    %c0_i32_0 = arith.constant 0 : i32
    %c0_i32_1 = arith.constant 0 : i32
    return %c0_i32, %c0_i32_0 : i32, i32
  }
  func.func @transform_4(%arg0: i32) -> (i32, i32) {
    %c0_i32 = arith.constant 0 : i32
    %c0_i32_0 = arith.constant 0 : i32
    %c0_i32_1 = arith.constant 0 : i32
    return %c0_i32, %c0_i32_0 : i32, i32
  }
  func.func @transform_5(%arg0: i32) -> (i32, i32) {
    %c0_i32 = arith.constant 0 : i32
    %c0_i32_0 = arith.constant 0 : i32
    %c0_i32_1 = arith.constant 0 : i32
    return %c0_i32, %c0_i32_0 : i32, i32
  }
  func.func @transform_6(%arg0: i32) -> (i32, i32) {
    %c0_i32 = arith.constant 0 : i32
    %c0_i32_0 = arith.constant 0 : i32
    return %arg0, %c0_i32 : i32, i32
  }
}

</mosaic_0001>

<bundles_post_ra>
// kernel: tpu_custom_call.1
= control target key start
LH: loop header
LB: loop body
LE: loop exit
PB: predicated region body
PF: predicated region fallthrough
CT: control target
= control target key end

     0   :  { %v395_v2 = vmov 0   ;;  %s498_s0 = inlined_call_operand.vmem [shape: s32[16,1], index: 0, kind: input, shape index: {}]   ;;  %s499_s1 = inlined_call_operand.vmem [shape: s32[16,1], index: 1, kind: input, shape index: {}]   ;;  %s500_s2 = inlined_call_operand.vmem [shape: f32[50,32], index: 2, kind: input, shape index: {}]   ;;  %s501_s3 = inlined_call_operand.vmem [shape: f32[16,32], index: 3, kind: input, shape index: {}]   ;;  %s502_s4 = inlined_call_operand.vmem [shape: f32[1,32], index: 4, kind: input, shape index: {}]   ;;  %s503_s5 = inlined_call_operand.vmem [shape: f32[1,32], index: 5, kind: input, shape index: {}]   ;;  %s504_s6 = inlined_call_operand.hbm [shape: f32[16,32], index: 6, kind: output, shape index: {}]  }
   0x1   :  { %v25_v0 = vld [vmem:[%s498_s0 + $0x8] sm:$0xff]  ;;  %v24_v1 = vld [vmem:[%s498_s0] sm:$0xff]  ;;  %366 = vset.pattern.permute.xlu1 %v395_v2  ;;  %365 = vset.pattern.permute.xlu0 %v395_v2  ;;  %v56_v8 = vld [vmem:[%s500_s2 + $0x10] sm:$0xff] }
   0x2   :  { %v27_v3 = vld [vmem:[%s499_s1 + $0x8] sm:$0xff]  ;;  %v54_v4 = vld [vmem:[%s500_s2] sm:$0xff]  ;;  %34 = vperm.xlu1 %366, %v25_v0   ;;  %31 = vperm.xlu0 %365, %v24_v1   ;;  %v57_v9 = vld [vmem:[%s500_s2 + $0x18] sm:$0xff] }
   0x3   :  { %v55_v5 = vld [vmem:[%s500_s2 + $0x8] sm:$0xff]  ;;  %v26_v6 = vld [vmem:[%s499_s1] sm:$0xff]  ;;  %v350_v10 = vpack.c.bf16 %v57_v9, %v56_v8 }
   0x4   :  { %v346_v7 = vpack.c.bf16 %v55_v5, %v54_v4  ;;  %v58_v11 = vld [vmem:[%s500_s2 + $0x20] sm:$0xff]  ;;  %v59_v12 = vld [vmem:[%s500_s2 + $0x28] sm:$0xff] }
   0x5   :  { %v61_v13 = vld [vmem:[%s501_s3] sm:$0xff]  ;;  %v62_v14 = vld [vmem:[%s501_s3 + $0x8] sm:$0xff] }
   0x6   :  { %347 = vmatprep.subr.bf16.mxu0 %v346_v7 }
   0x7   :  { %11 = vsyncpa [#allocation3], 0  ;;  %349 = vmatpush3.bf16.msra.mxu0 %v346_v7  ;;  %v342_v15 = vpack.c.bf16 %v62_v14, %v61_v13  ;;  %46 = vperm.xlu1 %366, %v27_v3   ;;  %v354_v16 = vpack.c.bf16 %v59_v12, %v58_v11  ;;  %v60_v17 = vld [vmem:[%s500_s2 + $0x30] sm:$0x3]  ;;  %vm152_vm0 = vcmask 1041408   ;;  %v28_v18 = vlaneseq  ;;  %s397_s23 = smov [#allocation2]  }
   0x8   :  { %43 = vperm.xlu0 %365, %v26_v6   ;;  %351 = vmatprep.subr.bf16.mxu0 %v350_v10  ;;  %vm145_vm1 = vcmask 408576   ;;  %v396_v22 = vmov 0.0   ;;  %vm63_vm4 = vcmask 130048   ;;  %vm231_vm7 = vcmask 261120   ;;  %v303_v54 = vld [vmem:[%s502_s4] ss:$0 sm:$0xff] }
   0x9   :  { %343 = vmatprep.subr.bf16.mxu1 %v342_v15  ;;  %v29_v19 = vand.u32 127, %v28_v18  ;;  %v304_v56 = vld [vmem:[%s503_s5] ss:$0 sm:$0xff]  ;;  %s283_s24 = sshll.u32 %s397_s23, 4  ;;  %s284_s24 = int_to_ptr.vmem [resolvable:$true] %s283_s24 }
   0xa   :  { %345 = vmatpush3.bf16.msra.mxu1 %v342_v15  ;;  %s371_s25 = scalar_lea.vmem %s284_s24, 256  ;;  %p376_p1 = scmp.lt.s32.totalorder %s284_s24, %s284_s24 }
   0xb   :  { %353 = vmatpush3.bf16.msra.mxu0 %v350_v10  ;;  %p372_p0 = scmp.ne.s32.totalorder %s284_s24, %s371_s25  ;;  %p377_p2 = scmp.lt.s32.totalorder %s371_s25, %s371_s25 }
   0xc   :  { %355 = vmatprep.subr.bf16.mxu0 %v354_v16 }
   0xd   :  { %p378_p3 = por %p377_p2, %p376_p1 }
   0xf   :  { %357 = vmatpush3.bf16.msra.mxu0 %v354_v16  ;;  %p379_p4 = pnand %p378_p3, %p372_p0 }
  0x10   :  { %337 = vmatprep.subr.msk.mxu0 %vm152_vm0, %v60_v17 }
  0x13   :  { %338 = vmatpush3.msk.msra.mxu0 %vm152_vm0, %v60_v17 }
  0x81   :  { %v35_v20 = vpop.permute.xlu1 %34  ;;  %v32_v21 = vpop.permute.xlu0 %31 }
  0x82   :  { %vm37_vm2 = vcmp.eq.s32.totalorder %v35_v20, %v29_v19  ;;  %vm36_vm3 = vcmp.eq.s32.totalorder %v32_v21, %v29_v19 }
  0x83   :  { %v295_v23 = vsel %vm37_vm2, 1.0, %v396_v22  ;;  %v294_v24 = vsel %vm36_vm3, 1.0, %v396_v22 }
  0x84   :  { %339 = vmatprep.mubr.msk.f32.mxu0 %vm145_vm1, %v294_v24 }
  0x85   :  { %340 = vmatmul.mubr.msk.f32.vlgmr.msra.gmra.mrb[0].mxu0 %vm145_vm1, %v295_v23 }
  0x86   :  { %v47_v25 = vpop.permute.xlu1 %46 }
  0x87   :  { %v44_v26 = vpop.permute.xlu0 %43  ;;  %vm49_vm5 = vcmp.eq.s32.totalorder %v47_v25, %v29_v19 }
  0x88   :  { %vm48_vm6 = vcmp.eq.s32.totalorder %v44_v26, %v29_v19  ;;  %v297_v27 = vsel %vm49_vm5, 1.0, %v396_v22 }
  0x89   :  { %v296_v28 = vsel %vm48_vm6, 1.0, %v396_v22 }
  0x8a   :  { %322 = vmatprep.mubr.msk.f32.mxu1 %vm63_vm4, %v296_v28 }
  0x8b   :  { %323 = vmatmul.mubr.msk.f32.vlgmr.msra.gmra.mrb[0].mxu1 %vm63_vm4, %v297_v27 }
 0x158   :  { %v341_v29 = vpop.f32.mrb[0].mxu0 }
 0x159   :  { %v222_v30 = vpop.f32.mrb[1].mxu0 }
 0x15e   :  { %v324_v31 = vpop.f32.mrb[0].mxu1 }
 0x15f   :  { %v228_v32 = vadd.f32 %v341_v29, %v324_v31  ;;  %v136_v33 = vpop.f32.mrb[1].mxu1 }
 0x160   :  { %v223_v34 = vadd.f32 %v222_v30, %v136_v33 }
 0x161   :  { %v235_v35 = vsel %vm231_vm7, %v228_v32, 0.0 }
 0x162   :  { %236 = vadd.xlane.f32.xlu1 %v235_v35  ;;  %v232_v36 = vsel %vm231_vm7, %v223_v34, 0.0 }
 0x163   :  { %233 = vadd.xlane.f32.xlu0 %v232_v36 }
 0x1ef   :  { %v237_v37 = vpop.xlane.xlu1 %236 }
 0x1f0   :  { %v239_v38 = vmul.f32 0.03125, %v237_v37  ;;  %v234_v39 = vpop.xlane.xlu0 %233 }
 0x1f1   :  { %v238_v40 = vmul.f32 0.03125, %v234_v39 }
 0x1f2   :  { %v241_v41 = vsub.f32 %v228_v32, %v239_v38 }
 0x1f3   :  { %v240_v42 = vsub.f32 %v223_v34, %v238_v40 }
 0x1f4   :  { %v243_v45 = vmul.f32 %v241_v41, %v241_v41 }
 0x1f5   :  { %v242_v43 = vmul.f32 %v240_v42, %v240_v42 }
 0x1f6   :  { %v247_v46 = vsel %vm231_vm7, %v243_v45, 0.0 }
 0x1f7   :  { %v244_v44 = vsel %vm231_vm7, %v242_v43, 0.0 }
 0x1f8   :  { %245 = vadd.xlane.f32.xlu0 %v244_v44 }
 0x1fc   :  { %248 = vadd.xlane.f32.xlu0 %v247_v46 }
 0x285   :  { %v246_v47 = vpop.xlane.xlu0 %245 }
 0x286   :  { %v250_v48 = vmul.f32 0.03125, %v246_v47 }
 0x288   :  { %v252_v49 = vadd.f32 1e-12, %v250_v48 }
 0x289   :  { %v249_v50 = vpop.xlane.xlu0 %248 }
 0x28a   :  { %367 = vrsqrt.f32 %v252_v49  ;;  %v251_v51 = vmul.f32 0.03125, %v249_v50 }
 0x28c   :  { %v253_v52 = vadd.f32 1e-12, %v251_v51 }
 0x28e   :  { %369 = vrsqrt.f32 %v253_v52 }
 0x294   :  { %v368_v53 = vpop.eup %367 }
 0x295   :  { %v256_v55 = vmul.f32 %v368_v53, %v240_v42 }
 0x297   :  { %v265_v57 = vmul.f32 %v303_v54, %v256_v55 }
 0x298   :  { %v370_v58 = vpop.eup %369 }
 0x299   :  { %v257_v59 = vmul.f32 %v370_v58, %v241_v41  ;;  %v274_v60 = vadd.f32 %v304_v56, %v265_v57 }
 0x29b   :  { %v266_v61 = vmul.f32 %v303_v54, %v257_v59  ;;  %276 = vst.msk [vmem:[#allocation2] sm:$0xff] %vm231_vm7, %v274_v60 }
 0x29d   :  { %v275_v62 = vadd.f32 %v304_v56, %v266_v61 }
 0x29f   :  { %277 = vst.msk [vmem:[#allocation2 + $0x8] sm:$0xff] %vm231_vm7, %v275_v62 }
 0x2a0   :  { %382 = shalt.err (!%p379_p4)
}
 0x2a1   :  { %s383_s26 = scalar_lea.hbm %s504_s6, 256 }
 0x2a2   :  { %p384_p5 = scmp.ne.s32.totalorder %s504_s6, %s383_s26  ;;  %p387_p6 = scmp.lt.u32.totalorder %s383_s26, %s504_s6 }
 0x2a4   :  { %p389_p7 = pnand %p387_p6, %p384_p5 }
 0x2a6   :  { %392 = shalt.err (!%p389_p7)
}
 0x2a7   :  { %s398_s7 = smov 128   ;;  %s399_s8 = smov 8  }
 0x2a8   :  { %289 = dma.vmem_to_hbm [thread:$0]  %s284_s24, 256, %s504_s6, [#allocation3], %s398_s7, %s398_s7, %s399_s8  }
 0x2a9   :  { %393 = dma.done.wait [#allocation3], 256  }
 0x2aa   :  { %394 = vsyncadd [#allocation3], 4294967040 }
 0x2ab   :  { %293 = vsyncpa [#allocation3], 1 }

</bundles_post_ra>
